<compile_context>
chip_gen: v7x
topology: tpu7x:2x2x1
jax: 0.10.0
libtpu: 0.0.40
codegen_flags: <defaults>
</compile_context>

<pallas_src>
import math

import jax
import jax.numpy as jnp
from jax import lax
from jax.experimental import pallas as pl
from jax.experimental.pallas import tpu as pltpu


_DMA_SLOTS = 8                                 # outstanding row DMAs (HBM-gather path)
_VMEM_TABLE_BYTES_LIMIT = 20 * 1024 * 1024     # resident-table threshold (safe on v7x 64 MiB)


def _round_up(x: int, m: int) -> int:
    return ((x + m - 1) // m) * m


def _sublane_pack(dtype) -> int:
    # 8 for f32, 16 for bf16, 32 for int8/fp8.
    itemsize = jnp.dtype(dtype).itemsize
    return max(8, 32 // itemsize)


# --------------------------------------------------------------------------- #
# Fast path: embedding table resident in VMEM, per-row dynamic-slice copies.
# --------------------------------------------------------------------------- #
def _readin_vmem_kernel(ids_ref, table_ref, out_ref):
    # ids_ref   : (N_pad,) int32 in SMEM (scalar prefetch)
    # table_ref : (V, H) VMEM, constant index_map -> single DMA, resident
    # out_ref   : (T, H) VMEM output block for this chunk
    chunk = pl.program_id(0)
    tokens_per_block = out_ref.shape[0]
    vocab = table_ref.shape[0]
    base = chunk * tokens_per_block

    def body(t, carry):
        tok = ids_ref[base + t]
        tok = jnp.minimum(jnp.maximum(tok, 0), vocab - 1)      # clamp OOB ids
        out_ref[pl.ds(t, 1), :] = table_ref[pl.ds(tok, 1), :]
        return carry

    lax.fori_loop(0, tokens_per_block, body, 0,
                  unroll=(tokens_per_block <= 64))


# --------------------------------------------------------------------------- #
# Large-table path: table stays in HBM, rolling bank of in-flight row DMAs.
# --------------------------------------------------------------------------- #
def _readin_hbm_kernel(ids_ref, table_hbm, out_ref, sems):
    # ids_ref   : (N_pad,) int32 in SMEM (scalar prefetch)
    # table_hbm : (V, H) raw HBM ref (memory_space=pl.ANY)
    # out_ref   : (T, H) VMEM output block; rows are DMA'd into it directly
    # sems      : (_DMA_SLOTS,) DMA semaphores -> up to _DMA_SLOTS DMAs in flight
    chunk = pl.program_id(0)
    tokens_per_block = out_ref.shape[0]
    vocab = table_hbm.shape[0]
    base = chunk * tokens_per_block

    def row_copy(t, slot):
        tok = ids_ref[base + t]
        tok = jnp.minimum(jnp.maximum(tok, 0), vocab - 1)      # clamp OOB ids
        return pltpu.make_async_copy(
            table_hbm.at[pl.ds(tok, 1), :],
            out_ref.at[pl.ds(t, 1), :],
            sems.at[slot],
        )

    # Prime the pipeline with up to _DMA_SLOTS outstanding row fetches.
    for t in range(min(_DMA_SLOTS, tokens_per_block)):
        row_copy(t, t).start()

    def body(t, carry):
        slot = t % _DMA_SLOTS
        # Wait for row t's DMA (same-shape descriptor on the same semaphore).
        pltpu.make_async_copy(
            table_hbm.at[pl.ds(0, 1), :],
            out_ref.at[pl.ds(0, 1), :],
            sems.at[slot],
        ).wait()

        # Refill the slot so _DMA_SLOTS row fetches stay in flight.
        @pl.when(t + _DMA_SLOTS < tokens_per_block)
        def _():
            row_copy(t + _DMA_SLOTS, slot).start()

        return carry

    lax.fori_loop(0, tokens_per_block, body, 0)


# --------------------------------------------------------------------------- #
# Wrapper (ReadIn.forward equivalent)
# --------------------------------------------------------------------------- #
def read_in(input_token_ids: jax.Array, emb_table: jax.Array,
            *, tokens_per_block: int | None = None,
            force_hbm_gather: bool = False) -> jax.Array:
    """Embedding lookup matching nn.Embedding: int ids (...,) -> (..., H)."""
    orig_shape = tuple(input_token_ids.shape)
    vocab, hidden = emb_table.shape
    dtype = emb_table.dtype
    itemsize = jnp.dtype(dtype).itemsize

    n_tokens = math.prod(orig_shape) if orig_shape else 1
    ids_flat = input_token_ids.reshape(n_tokens).astype(jnp.int32)

    # Chunk size: sublane-dense and capped so pipelined output blocks stay small.
    sub = _sublane_pack(dtype)
    t_blk = (min(256, _round_up(n_tokens, sub)) if tokens_per_block is None
             else _round_up(tokens_per_block, sub))
    max_rows = max(sub, ((2 * 1024 * 1024) // (hidden * itemsize)) // sub * sub)
    t_blk = max(sub, min(t_blk, max_rows))

    n_pad = _round_up(n_tokens, t_blk)
    num_chunks = n_pad // t_blk
    if n_pad != n_tokens:
        ids_flat = jnp.pad(ids_flat, (0, n_pad - n_tokens))

    table_bytes = vocab * hidden * itemsize
    block_bytes = t_blk * hidden * itemsize
    use_vmem_table = (not force_hbm_gather) and table_bytes <= _VMEM_TABLE_BYTES_LIMIT

    # VMEM budget: (possibly double-buffered) resident table + pipelined output
    # blocks + headroom; capped at 64 MiB so it is valid on v7x as well.
    vmem_limit = (2 * table_bytes if use_vmem_table else 0) + 4 * block_bytes + (4 << 20)
    vmem_limit = int(min(64 * 1024 * 1024, max(32 * 1024 * 1024, vmem_limit)))

    cost = pl.CostEstimate(
        flops=0,
        transcendentals=0,
        bytes_accessed=(table_bytes if use_vmem_table else n_pad * hidden * itemsize)
        + n_pad * hidden * itemsize + n_pad * 4,
    )
    compiler_params = pltpu.CompilerParams(
        dimension_semantics=("parallel",),   # distinct out block per chunk; 2 TCs on v7x
        vmem_limit_bytes=vmem_limit,
    )

    if use_vmem_table:
        kernel = _readin_vmem_kernel
        grid_spec = pltpu.PrefetchScalarGridSpec(
            num_scalar_prefetch=1,
            grid=(num_chunks,),
            in_specs=[pl.BlockSpec((vocab, hidden), lambda i, ids: (0, 0))],
            out_specs=pl.BlockSpec((t_blk, hidden), lambda i, ids: (i, 0)),
        )
    else:
        kernel = _readin_hbm_kernel
        grid_spec = pltpu.PrefetchScalarGridSpec(
            num_scalar_prefetch=1,
            grid=(num_chunks,),
            in_specs=[pl.BlockSpec(memory_space=pl.ANY)],
            out_specs=pl.BlockSpec((t_blk, hidden), lambda i, ids: (i, 0)),
            scratch_shapes=[pltpu.SemaphoreType.DMA((_DMA_SLOTS,))],
        )

    out_flat = pl.pallas_call(
        kernel,
        out_shape=jax.ShapeDtypeStruct((n_pad, hidden), dtype),
        grid_spec=grid_spec,
        compiler_params=compiler_params,
        cost_estimate=cost,
    )(ids_flat, emb_table)

    if n_pad != n_tokens:
        out_flat = out_flat[:n_tokens]
    return out_flat.reshape(*orig_shape, hidden)


if __name__ == "__main__":
    # ReadIn(vocab_size, hidden_size) with small, deterministic shapes.
    vocab_size = 64
    hidden_size = 128
    batch = 2
    seq = 8

    key = jax.random.PRNGKey(0)
    k_emb, k_ids = jax.random.split(key)

    # nn.Embedding default init: N(0, 1)
    emb_table = jax.random.normal(k_emb, (vocab_size, hidden_size), dtype=jnp.float32)
    input_token_ids = jax.random.randint(
        k_ids, (batch, seq), minval=0, maxval=vocab_size, dtype=jnp.int32
    )

    ref = emb_table[input_token_ids]

    # Fast path: table resident in VMEM (exercised for this config).
    out_vmem = read_in(input_token_ids, emb_table)
    jax.block_until_ready(out_vmem)
    assert out_vmem.shape == (batch, seq, hidden_size)
    assert jnp.array_equal(out_vmem, ref), "VMEM-table path mismatch vs reference gather"

    # Large-table path: table kept in HBM, rolling manual row-DMA gather.
    out_hbm = read_in(input_token_ids, emb_table, force_hbm_gather=True)
    jax.block_until_ready(out_hbm)
    assert jnp.array_equal(out_hbm, ref), "HBM-gather path mismatch vs reference gather"

    print("KERNEL_OK")
</pallas_src>

<mosaic_0001>
module attributes {stable_mosaic.version = 11 : i64} {
  func.func @_readin_vmem_kernel(%arg0: i32, %arg1: memref<16xi32, #tpu.memory_space<smem>>, %arg2: memref<64x128xf32, #tpu.memory_space<vmem>>, %arg3: memref<16x128xf32, #tpu.memory_space<vmem>>) attributes {dimension_semantics = [#tpu.dimension_semantics<parallel>], iteration_bounds = array<i64: 1>, scalar_prefetch = 1 : i64, scratch_operands = 0 : i64, tpu.core_type = #tpu.core_type<tc>, window_params = [{pipeline_mode = #tpu.pipeline_mode<synchronous>, transform_indices = @transform_0, window_bounds = array<i64: 64, 128>}, {transform_indices = @transform_1, window_bounds = array<i64: 16, 128>}]} {
    %c16_i32 = arith.constant 16 : i32
    %0 = arith.muli %arg0, %c16_i32 : i32
    %c0_i32 = arith.constant 0 : i32
    %1 = arith.addi %0, %c0_i32 : i32
    %2 = arith.index_cast %1 : i32 to index
    %3 = memref.load %arg1[%2] : memref<16xi32, #tpu.memory_space<smem>>
    %c0_i32_0 = arith.constant 0 : i32
    %4 = arith.maxsi %3, %c0_i32_0 : i32
    %c63_i32 = arith.constant 63 : i32
    %5 = arith.minsi %4, %c63_i32 : i32
    %6 = arith.index_cast %5 : i32 to index
    %c0 = arith.constant 0 : index
    %7 = vector.load %arg2[%6, %c0] : memref<64x128xf32, #tpu.memory_space<vmem>>, vector<1x128xf32>
    %8 = arith.index_cast %c0_i32 : i32 to index
    %c0_1 = arith.constant 0 : index
    %9 = vector.load %arg3[%8, %c0_1] : memref<16x128xf32, #tpu.memory_space<vmem>>, vector<1x128xf32>
    tpu.vector_store %arg3[%8, %c0_1], %7 {strides = array<i32>} : memref<16x128xf32, #tpu.memory_space<vmem>>, vector<1x128xf32>,
    %c1_i32 = arith.constant 1 : i32
    %10 = arith.addi %0, %c1_i32 : i32
    %11 = arith.index_cast %10 : i32 to index
    %12 = memref.load %arg1[%11] : memref<16xi32, #tpu.memory_space<smem>>
    %c0_i32_2 = arith.constant 0 : i32
    %13 = arith.maxsi %12, %c0_i32_2 : i32
    %c63_i32_3 = arith.constant 63 : i32
    %14 = arith.minsi %13, %c63_i32_3 : i32
    %15 = arith.index_cast %14 : i32 to index
    %c0_4 = arith.constant 0 : index
    %16 = vector.load %arg2[%15, %c0_4] : memref<64x128xf32, #tpu.memory_space<vmem>>, vector<1x128xf32>
    %17 = arith.index_cast %c1_i32 : i32 to index
    %c0_5 = arith.constant 0 : index
    %18 = vector.load %arg3[%17, %c0_5] : memref<16x128xf32, #tpu.memory_space<vmem>>, vector<1x128xf32>
    tpu.vector_store %arg3[%17, %c0_5], %16 {strides = array<i32>} : memref<16x128xf32, #tpu.memory_space<vmem>>, vector<1x128xf32>,
    %c2_i32 = arith.constant 2 : i32
    %19 = arith.addi %0, %c2_i32 : i32
    %20 = arith.index_cast %19 : i32 to index
    %21 = memref.load %arg1[%20] : memref<16xi32, #tpu.memory_space<smem>>
    %c0_i32_6 = arith.constant 0 : i32
    %22 = arith.maxsi %21, %c0_i32_6 : i32
    %c63_i32_7 = arith.constant 63 : i32
    %23 = arith.minsi %22, %c63_i32_7 : i32
    %24 = arith.index_cast %23 : i32 to index
    %c0_8 = arith.constant 0 : index
    %25 = vector.load %arg2[%24, %c0_8] : memref<64x128xf32, #tpu.memory_space<vmem>>, vector<1x128xf32>
    %26 = arith.index_cast %c2_i32 : i32 to index
    %c0_9 = arith.constant 0 : index
    %27 = vector.load %arg3[%26, %c0_9] : memref<16x128xf32, #tpu.memory_space<vmem>>, vector<1x128xf32>
    tpu.vector_store %arg3[%26, %c0_9], %25 {strides = array<i32>} : memref<16x128xf32, #tpu.memory_space<vmem>>, vector<1x128xf32>,
    %c3_i32 = arith.constant 3 : i32
    %28 = arith.addi %0, %c3_i32 : i32
    %29 = arith.index_cast %28 : i32 to index
    %30 = memref.load %arg1[%29] : memref<16xi32, #tpu.memory_space<smem>>
    %c0_i32_10 = arith.constant 0 : i32
    %31 = arith.maxsi %30, %c0_i32_10 : i32
    %c63_i32_11 = arith.constant 63 : i32
    %32 = arith.minsi %31, %c63_i32_11 : i32
    %33 = arith.index_cast %32 : i32 to index
    %c0_12 = arith.constant 0 : index
    %34 = vector.load %arg2[%33, %c0_12] : memref<64x128xf32, #tpu.memory_space<vmem>>, vector<1x128xf32>
    %35 = arith.index_cast %c3_i32 : i32 to index
    %c0_13 = arith.constant 0 : index
    %36 = vector.load %arg3[%35, %c0_13] : memref<16x128xf32, #tpu.memory_space<vmem>>, vector<1x128xf32>
    tpu.vector_store %arg3[%35, %c0_13], %34 {strides = array<i32>} : memref<16x128xf32, #tpu.memory_space<vmem>>, vector<1x128xf32>,
    %c4_i32 = arith.constant 4 : i32
    %37 = arith.addi %0, %c4_i32 : i32
    %38 = arith.index_cast %37 : i32 to index
    %39 = memref.load %arg1[%38] : memref<16xi32, #tpu.memory_space<smem>>
    %c0_i32_14 = arith.constant 0 : i32
    %40 = arith.maxsi %39, %c0_i32_14 : i32
    %c63_i32_15 = arith.constant 63 : i32
    %41 = arith.minsi %40, %c63_i32_15 : i32
    %42 = arith.index_cast %41 : i32 to index
    %c0_16 = arith.constant 0 : index
    %43 = vector.load %arg2[%42, %c0_16] : memref<64x128xf32, #tpu.memory_space<vmem>>, vector<1x128xf32>
    %44 = arith.index_cast %c4_i32 : i32 to index
    %c0_17 = arith.constant 0 : index
    %45 = vector.load %arg3[%44, %c0_17] : memref<16x128xf32, #tpu.memory_space<vmem>>, vector<1x128xf32>
    tpu.vector_store %arg3[%44, %c0_17], %43 {strides = array<i32>} : memref<16x128xf32, #tpu.memory_space<vmem>>, vector<1x128xf32>,
    %c5_i32 = arith.constant 5 : i32
    %46 = arith.addi %0, %c5_i32 : i32
    %47 = arith.index_cast %46 : i32 to index
    %48 = memref.load %arg1[%47] : memref<16xi32, #tpu.memory_space<smem>>
    %c0_i32_18 = arith.constant 0 : i32
    %49 = arith.maxsi %48, %c0_i32_18 : i32
    %c63_i32_19 = arith.constant 63 : i32
    %50 = arith.minsi %49, %c63_i32_19 : i32
    %51 = arith.index_cast %50 : i32 to index
    %c0_20 = arith.constant 0 : index
    %52 = vector.load %arg2[%51, %c0_20] : memref<64x128xf32, #tpu.memory_space<vmem>>, vector<1x128xf32>
    %53 = arith.index_cast %c5_i32 : i32 to index
    %c0_21 = arith.constant 0 : index
    %54 = vector.load %arg3[%53, %c0_21] : memref<16x128xf32, #tpu.memory_space<vmem>>, vector<1x128xf32>
    tpu.vector_store %arg3[%53, %c0_21], %52 {strides = array<i32>} : memref<16x128xf32, #tpu.memory_space<vmem>>, vector<1x128xf32>,
    %c6_i32 = arith.constant 6 : i32
    %55 = arith.addi %0, %c6_i32 : i32
    %56 = arith.index_cast %55 : i32 to index
    %57 = memref.load %arg1[%56] : memref<16xi32, #tpu.memory_space<smem>>
    %c0_i32_22 = arith.constant 0 : i32
    %58 = arith.maxsi %57, %c0_i32_22 : i32
    %c63_i32_23 = arith.constant 63 : i32
    %59 = arith.minsi %58, %c63_i32_23 : i32
    %60 = arith.index_cast %59 : i32 to index
    %c0_24 = arith.constant 0 : index
    %61 = vector.load %arg2[%60, %c0_24] : memref<64x128xf32, #tpu.memory_space<vmem>>, vector<1x128xf32>
    %62 = arith.index_cast %c6_i32 : i32 to index
    %c0_25 = arith.constant 0 : index
    %63 = vector.load %arg3[%62, %c0_25] : memref<16x128xf32, #tpu.memory_space<vmem>>, vector<1x128xf32>
    tpu.vector_store %arg3[%62, %c0_25], %61 {strides = array<i32>} : memref<16x128xf32, #tpu.memory_space<vmem>>, vector<1x128xf32>,
    %c7_i32 = arith.constant 7 : i32
    %64 = arith.addi %0, %c7_i32 : i32
    %65 = arith.index_cast %64 : i32 to index
    %66 = memref.load %arg1[%65] : memref<16xi32, #tpu.memory_space<smem>>
    %c0_i32_26 = arith.constant 0 : i32
    %67 = arith.maxsi %66, %c0_i32_26 : i32
    %c63_i32_27 = arith.constant 63 : i32
    %68 = arith.minsi %67, %c63_i32_27 : i32
    %69 = arith.index_cast %68 : i32 to index
    %c0_28 = arith.constant 0 : index
    %70 = vector.load %arg2[%69, %c0_28] : memref<64x128xf32, #tpu.memory_space<vmem>>, vector<1x128xf32>
    %71 = arith.index_cast %c7_i32 : i32 to index
    %c0_29 = arith.constant 0 : index
    %72 = vector.load %arg3[%71, %c0_29] : memref<16x128xf32, #tpu.memory_space<vmem>>, vector<1x128xf32>
    tpu.vector_store %arg3[%71, %c0_29], %70 {strides = array<i32>} : memref<16x128xf32, #tpu.memory_space<vmem>>, vector<1x128xf32>,
    %c8_i32 = arith.constant 8 : i32
    %73 = arith.addi %0, %c8_i32 : i32
    %74 = arith.index_cast %73 : i32 to index
    %75 = memref.load %arg1[%74] : memref<16xi32, #tpu.memory_space<smem>>
    %c0_i32_30 = arith.constant 0 : i32
    %76 = arith.maxsi %75, %c0_i32_30 : i32
    %c63_i32_31 = arith.constant 63 : i32
    %77 = arith.minsi %76, %c63_i32_31 : i32
    %78 = arith.index_cast %77 : i32 to index
    %c0_32 = arith.constant 0 : index
    %79 = vector.load %arg2[%78, %c0_32] : memref<64x128xf32, #tpu.memory_space<vmem>>, vector<1x128xf32>
    %80 = arith.index_cast %c8_i32 : i32 to index
    %c0_33 = arith.constant 0 : index
    %81 = vector.load %arg3[%80, %c0_33] : memref<16x128xf32, #tpu.memory_space<vmem>>, vector<1x128xf32>
    tpu.vector_store %arg3[%80, %c0_33], %79 {strides = array<i32>} : memref<16x128xf32, #tpu.memory_space<vmem>>, vector<1x128xf32>,
    %c9_i32 = arith.constant 9 : i32
    %82 = arith.addi %0, %c9_i32 : i32
    %83 = arith.index_cast %82 : i32 to index
    %84 = memref.load %arg1[%83] : memref<16xi32, #tpu.memory_space<smem>>
    %c0_i32_34 = arith.constant 0 : i32
    %85 = arith.maxsi %84, %c0_i32_34 : i32
    %c63_i32_35 = arith.constant 63 : i32
    %86 = arith.minsi %85, %c63_i32_35 : i32
    %87 = arith.index_cast %86 : i32 to index
    %c0_36 = arith.constant 0 : index
    %88 = vector.load %arg2[%87, %c0_36] : memref<64x128xf32, #tpu.memory_space<vmem>>, vector<1x128xf32>
    %89 = arith.index_cast %c9_i32 : i32 to index
    %c0_37 = arith.constant 0 : index
    %90 = vector.load %arg3[%89, %c0_37] : memref<16x128xf32, #tpu.memory_space<vmem>>, vector<1x128xf32>
    tpu.vector_store %arg3[%89, %c0_37], %88 {strides = array<i32>} : memref<16x128xf32, #tpu.memory_space<vmem>>, vector<1x128xf32>,
    %c10_i32 = arith.constant 10 : i32
    %91 = arith.addi %0, %c10_i32 : i32
    %92 = arith.index_cast %91 : i32 to index
    %93 = memref.load %arg1[%92] : memref<16xi32, #tpu.memory_space<smem>>
    %c0_i32_38 = arith.constant 0 : i32
    %94 = arith.maxsi %93, %c0_i32_38 : i32
    %c63_i32_39 = arith.constant 63 : i32
    %95 = arith.minsi %94, %c63_i32_39 : i32
    %96 = arith.index_cast %95 : i32 to index
    %c0_40 = arith.constant 0 : index
    %97 = vector.load %arg2[%96, %c0_40] : memref<64x128xf32, #tpu.memory_space<vmem>>, vector<1x128xf32>
    %98 = arith.index_cast %c10_i32 : i32 to index
    %c0_41 = arith.constant 0 : index
    %99 = vector.load %arg3[%98, %c0_41] : memref<16x128xf32, #tpu.memory_space<vmem>>, vector<1x128xf32>
    tpu.vector_store %arg3[%98, %c0_41], %97 {strides = array<i32>} : memref<16x128xf32, #tpu.memory_space<vmem>>, vector<1x128xf32>,
    %c11_i32 = arith.constant 11 : i32
    %100 = arith.addi %0, %c11_i32 : i32
    %101 = arith.index_cast %100 : i32 to index
    %102 = memref.load %arg1[%101] : memref<16xi32, #tpu.memory_space<smem>>
    %c0_i32_42 = arith.constant 0 : i32
    %103 = arith.maxsi %102, %c0_i32_42 : i32
    %c63_i32_43 = arith.constant 63 : i32
    %104 = arith.minsi %103, %c63_i32_43 : i32
    %105 = arith.index_cast %104 : i32 to index
    %c0_44 = arith.constant 0 : index
    %106 = vector.load %arg2[%105, %c0_44] : memref<64x128xf32, #tpu.memory_space<vmem>>, vector<1x128xf32>
    %107 = arith.index_cast %c11_i32 : i32 to index
    %c0_45 = arith.constant 0 : index
    %108 = vector.load %arg3[%107, %c0_45] : memref<16x128xf32, #tpu.memory_space<vmem>>, vector<1x128xf32>
    tpu.vector_store %arg3[%107, %c0_45], %106 {strides = array<i32>} : memref<16x128xf32, #tpu.memory_space<vmem>>, vector<1x128xf32>,
    %c12_i32 = arith.constant 12 : i32
    %109 = arith.addi %0, %c12_i32 : i32
    %110 = arith.index_cast %109 : i32 to index
    %111 = memref.load %arg1[%110] : memref<16xi32, #tpu.memory_space<smem>>
    %c0_i32_46 = arith.constant 0 : i32
    %112 = arith.maxsi %111, %c0_i32_46 : i32
    %c63_i32_47 = arith.constant 63 : i32
    %113 = arith.minsi %112, %c63_i32_47 : i32
    %114 = arith.index_cast %113 : i32 to index
    %c0_48 = arith.constant 0 : index
    %115 = vector.load %arg2[%114, %c0_48] : memref<64x128xf32, #tpu.memory_space<vmem>>, vector<1x128xf32>
    %116 = arith.index_cast %c12_i32 : i32 to index
    %c0_49 = arith.constant 0 : index
    %117 = vector.load %arg3[%116, %c0_49] : memref<16x128xf32, #tpu.memory_space<vmem>>, vector<1x128xf32>
    tpu.vector_store %arg3[%116, %c0_49], %115 {strides = array<i32>} : memref<16x128xf32, #tpu.memory_space<vmem>>, vector<1x128xf32>,
    %c13_i32 = arith.constant 13 : i32
    %118 = arith.addi %0, %c13_i32 : i32
    %119 = arith.index_cast %118 : i32 to index
    %120 = memref.load %arg1[%119] : memref<16xi32, #tpu.memory_space<smem>>
    %c0_i32_50 = arith.constant 0 : i32
    %121 = arith.maxsi %120, %c0_i32_50 : i32
    %c63_i32_51 = arith.constant 63 : i32
    %122 = arith.minsi %121, %c63_i32_51 : i32
    %123 = arith.index_cast %122 : i32 to index
    %c0_52 = arith.constant 0 : index
    %124 = vector.load %arg2[%123, %c0_52] : memref<64x128xf32, #tpu.memory_space<vmem>>, vector<1x128xf32>
    %125 = arith.index_cast %c13_i32 : i32 to index
    %c0_53 = arith.constant 0 : index
    %126 = vector.load %arg3[%125, %c0_53] : memref<16x128xf32, #tpu.memory_space<vmem>>, vector<1x128xf32>
    tpu.vector_store %arg3[%125, %c0_53], %124 {strides = array<i32>} : memref<16x128xf32, #tpu.memory_space<vmem>>, vector<1x128xf32>,
    %c14_i32 = arith.constant 14 : i32
    %127 = arith.addi %0, %c14_i32 : i32
    %128 = arith.index_cast %127 : i32 to index
    %129 = memref.load %arg1[%128] : memref<16xi32, #tpu.memory_space<smem>>
    %c0_i32_54 = arith.constant 0 : i32
    %130 = arith.maxsi %129, %c0_i32_54 : i32
    %c63_i32_55 = arith.constant 63 : i32
    %131 = arith.minsi %130, %c63_i32_55 : i32
    %132 = arith.index_cast %131 : i32 to index
    %c0_56 = arith.constant 0 : index
    %133 = vector.load %arg2[%132, %c0_56] : memref<64x128xf32, #tpu.memory_space<vmem>>, vector<1x128xf32>
    %134 = arith.index_cast %c14_i32 : i32 to index
    %c0_57 = arith.constant 0 : index
    %135 = vector.load %arg3[%134, %c0_57] : memref<16x128xf32, #tpu.memory_space<vmem>>, vector<1x128xf32>
    tpu.vector_store %arg3[%134, %c0_57], %133 {strides = array<i32>} : memref<16x128xf32, #tpu.memory_space<vmem>>, vector<1x128xf32>,
    %c15_i32 = arith.constant 15 : i32
    %136 = arith.addi %0, %c15_i32 : i32
    %137 = arith.index_cast %136 : i32 to index
    %138 = memref.load %arg1[%137] : memref<16xi32, #tpu.memory_space<smem>>
    %c0_i32_58 = arith.constant 0 : i32
    %139 = arith.maxsi %138, %c0_i32_58 : i32
    %c63_i32_59 = arith.constant 63 : i32
    %140 = arith.minsi %139, %c63_i32_59 : i32
    %141 = arith.index_cast %140 : i32 to index
    %c0_60 = arith.constant 0 : index
    %142 = vector.load %arg2[%141, %c0_60] : memref<64x128xf32, #tpu.memory_space<vmem>>, vector<1x128xf32>
    %143 = arith.index_cast %c15_i32 : i32 to index
    %c0_61 = arith.constant 0 : index
    %144 = vector.load %arg3[%143, %c0_61] : memref<16x128xf32, #tpu.memory_space<vmem>>, vector<1x128xf32>
    tpu.vector_store %arg3[%143, %c0_61], %142 {strides = array<i32>} : memref<16x128xf32, #tpu.memory_space<vmem>>, vector<1x128xf32>,
    %c16_i32_62 = arith.constant 16 : i32
    return
  }
  func.func @transform_0(%arg0: i32, %arg1: memref<16xi32, #tpu.memory_space<smem>>) -> (i32, i32) {
    %c0_i32 = arith.constant 0 : i32
    %c0_i32_0 = arith.constant 0 : i32
    %c0_i32_1 = arith.constant 0 : i32
    return %c0_i32, %c0_i32_0 : i32, i32
  }
  func.func @transform_1(%arg0: i32, %arg1: memref<16xi32, #tpu.memory_space<smem>>) -> (i32, i32) {
    %c0_i32 = arith.constant 0 : i32
    %c0_i32_0 = arith.constant 0 : i32
    return %arg0, %c0_i32 : i32, i32
  }
}

</mosaic_0001>

<bundles_post_ra>
// kernel: tpu_custom_call.1
= control target key start
LH: loop header
LB: loop body
LE: loop exit
PB: predicated region body
PF: predicated region fallthrough
CT: control target
= control target key end

     0   :  { %s509_s0 = inlined_call_operand.hbm [shape: s32[16], index: 0, kind: input, shape index: {}]   ;;  %s510_s1 = inlined_call_operand.hbm [shape: f32[64,128], index: 1, kind: input, shape index: {}]   ;;  %s511_s2 = inlined_call_operand.hbm [shape: f32[16,128], index: 2, kind: output, shape index: {}]  }
   0x1   :  { %s337_s11 = scalar_lea.hbm %s509_s0, 16 }
   0x2   :  { %p338_p0 = scmp.ne.s32.totalorder %s509_s0, %s337_s11  ;;  %p341_p1 = scmp.lt.u32.totalorder %s337_s11, %s509_s0 }
   0x4   :  { %p343_p2 = pnand %p341_p1, %p338_p0 }
   0x6   :  { %346 = shalt.err (!%p343_p2)  }
   0x7   :  { %s397_s16 = smov [#allocation3]  }
   0x8   :  { %8 = dma.hbm_to_smem %s509_s0, 16, %s397_s16, [#allocation2] }
   0x9   :  { %391 = dma.done.wait [#allocation2], 16 }
   0xa   :  { %392 = vsyncadd [#allocation2], 4294967280 }
   0xb   :  { %10 = sfence }
   0xc   :  { %11 = vsyncpa [#allocation5], 0 }
   0xd   :  { %12 = vsyncpa [#allocation6], 0  ;;  %s398_s19 = smov [#allocation4]   ;;  %s347_s23 = scalar_lea.hbm %s510_s1, 1024 }
   0xe   :  { %s18_s20 = sshll.u32 %s398_s19, 4  ;;  %p348_p3 = scmp.ne.s32.totalorder %s510_s1, %s347_s23  ;;  %s19_s20 = int_to_ptr.vmem [resolvable:$true] %s18_s20 }
   0xf   :  { %p351_p4 = scmp.lt.u32.totalorder %s347_s23, %s510_s1 }
  0x11   :  { %p353_p5 = pnand %p351_p4, %p348_p3 }
  0x13   :  { %356 = shalt.err (!%p353_p5)
}
  0x14   :  { %s357_s0 = scalar_lea.vmem %s19_s20, 1024  ;;  %p362_p7 = scmp.lt.s32.totalorder %s19_s20, %s19_s20 }
  0x15   :  { %p358_p6 = scmp.ne.s32.totalorder %s19_s20, %s357_s0  ;;  %p363_p8 = scmp.lt.s32.totalorder %s357_s0, %s357_s0 }
  0x17   :  { %p364_p9 = por %p363_p8, %p362_p7 }
  0x19   :  { %p365_p10 = pnand %p364_p9, %p358_p6 }
  0x1b   :  { %368 = shalt.err (!%p365_p10)
}
  0x1c   :  { %s399_s28 = smov 128   ;;  %s400_s29 = smov 8  }
  0x1d   :  { %24 = dma.hbm_to_vmem [thread:$0]  %s510_s1, 1024, %s19_s20, [#allocation5], %s399_s28, %s399_s28, %s400_s29  }
  0x1e   :  { %393 = dma.done.wait [#allocation5], 1024  }
  0x1f   :  { %394 = vsyncadd [#allocation5], 4294966272  ;;  %s29_s4 = sld [smem:[#allocation3]]  ;;  %s210_s5 = sld [smem:[#allocation3 + $0x1]] }
  0x20   :  { %s444_s6 = sld [smem:[#allocation3 + $0x2]]  ;;  %s446_s7 = sld [smem:[#allocation3 + $0x3]] }
  0x21   :  { %s448_s8 = sld [smem:[#allocation3 + $0x4]]  ;;  %s450_s9 = sld [smem:[#allocation3 + $0x5]] }
  0x22   :  { %s452_s10 = sld [smem:[#allocation3 + $0x6]]  ;;  %s454_s11 = sld [smem:[#allocation3 + $0x7]] }
  0x23   :  { %s456_s12 = sld [smem:[#allocation3 + $0x8]]  ;;  %s458_s1 = sld [smem:[#allocation3 + $0x9]] }
  0x24   :  { %s460_s13 = sld [smem:[#allocation3 + $0xa]]  ;;  %s462_s14 = sld [smem:[#allocation3 + $0xb]] }
  0x25   :  { %p30_p11 = scmp.gt.s32.totalorder %s29_s4, 0  ;;  %p205_p12 = scmp.lt.s32.totalorder %s29_s4, 63 }
  0x26   :  { %p39_p13 = scmp.gt.s32.totalorder %s210_s5, 0  ;;  %p211_p0 = scmp.lt.s32.totalorder %s210_s5, 63 }
  0x27   :  { %s513_s4 = smov (!%p30_p11, %s29_s4), 0  ;;  %p48_p1 = scmp.gt.s32.totalorder %s444_s6, 0 }
  0x28   :  { %s515_s5 = smov (!%p39_p13, %s210_s5), 0  ;;  %s517_s4 = smov (!%p205_p12, %s513_s4), 63 }
  0x29   :  { %s519_s5 = smov (!%p211_p0, %s515_s5), 63  ;;  %s34_s15 = scalar_lea.vmem [#allocation4], %s517_s4 }
  0x2a   :  { %v35_v0 = vld [vmem:[%s34_s15] sm:$0x1]  ;;  %p217_p2 = scmp.lt.s32.totalorder %s444_s6, 63  ;;  %s43_s16 = scalar_lea.vmem [#allocation4], %s519_s5 }
  0x2b   :  { %36 = vst [vmem:[#allocation7] sm:$0x1] %v35_v0  ;;  %v44_v1 = vld [vmem:[%s43_s16] sm:$0x1]  ;;  %s521_s6 = smov (!%p48_p1, %s444_s6), 0  ;;  %p57_p3 = scmp.gt.s32.totalorder %s446_s7, 0 }
  0x2c   :  { %45 = vst [vmem:[#allocation7 + $0x1] sm:$0x1] %v44_v1  ;;  %p223_p4 = scmp.lt.s32.totalorder %s446_s7, 63  ;;  %s523_s6 = smov (!%p217_p2, %s521_s6), 63 }
  0x2d   :  { %s525_s7 = smov (!%p57_p3, %s446_s7), 0  ;;  %p66_p5 = scmp.gt.s32.totalorder %s448_s8, 0 }
  0x2e   :  { %s52_s17 = scalar_lea.vmem [#allocation4], %s523_s6  ;;  %s527_s7 = smov (!%p223_p4, %s525_s7), 63 }
  0x2f   :  { %v53_v2 = vld [vmem:[%s52_s17] sm:$0x1]  ;;  %s67_s18 = scalar_select %p66_p5, %s448_s8, 0 }
  0x30   :  { %54 = vst [vmem:[#allocation7 + $0x2] sm:$0x1] %v53_v2  ;;  %p229_p6 = scmp.lt.s32.totalorder %s448_s8, 63  ;;  %s61_s19 = scalar_lea.vmem [#allocation4], %s527_s7 }
  0x31   :  { %v62_v3 = vld [vmem:[%s61_s19] sm:$0x1]  ;;  %p75_p7 = scmp.gt.s32.totalorder %s450_s9, 0  ;;  %p235_p8 = scmp.lt.s32.totalorder %s450_s9, 63 }
  0x32   :  { %63 = vst [vmem:[#allocation7 + $0x3] sm:$0x1] %v62_v3  ;;  %s529_s18 = smov (!%p229_p6, %s67_s18), 63  ;;  %p84_p9 = scmp.gt.s32.totalorder %s452_s10, 0 }
  0x33   :  { %s531_s9 = smov (!%p75_p7, %s450_s9), 0  ;;  %s70_s20 = scalar_lea.vmem [#allocation4], %s529_s18 }
  0x34   :  { %v71_v4 = vld [vmem:[%s70_s20] sm:$0x1]  ;;  %s533_s9 = smov (!%p235_p8, %s531_s9), 63  ;;  %p241_p10 = scmp.lt.s32.totalorder %s452_s10, 63 }
  0x35   :  { %72 = vst [vmem:[#allocation7 + $0x4] sm:$0x1] %v71_v4  ;;  %s85_s21 = scalar_select %p84_p9, %s452_s10, 0 }
  0x36   :  { %s79_s22 = scalar_lea.vmem [#allocation4], %s533_s9  ;;  %p93_p11 = scmp.gt.s32.totalorder %s454_s11, 0 }
  0x37   :  { %v80_v5 = vld [vmem:[%s79_s22] sm:$0x1]  ;;  %p247_p12 = scmp.lt.s32.totalorder %s454_s11, 63  ;;  %s535_s21 = smov (!%p241_p10, %s85_s21), 63 }
  0x38   :  { %81 = vst [vmem:[#allocation7 + $0x5] sm:$0x1] %v80_v5  ;;  %s537_s11 = smov (!%p93_p11, %s454_s11), 0  ;;  %p102_p13 = scmp.gt.s32.totalorder %s456_s12, 0 }
  0x39   :  { %s88_s23 = scalar_lea.vmem [#allocation4], %s535_s21  ;;  %s539_s11 = smov (!%p247_p12, %s537_s11), 63 }
  0x3a   :  { %v89_v6 = vld [vmem:[%s88_s23] sm:$0x1]  ;;  %s103_s24 = scalar_select %p102_p13, %s456_s12, 0 }
  0x3b   :  { %90 = vst [vmem:[#allocation7 + $0x6] sm:$0x1] %v89_v6  ;;  %p253_p0 = scmp.lt.s32.totalorder %s456_s12, 63  ;;  %s97_s25 = scalar_lea.vmem [#allocation4], %s539_s11 }
  0x3c   :  { %v98_v7 = vld [vmem:[%s97_s25] sm:$0x1]  ;;  %p111_p1 = scmp.gt.s32.totalorder %s458_s1, 0  ;;  %p259_p2 = scmp.lt.s32.totalorder %s458_s1, 63 }
  0x3d   :  { %99 = vst [vmem:[#allocation7 + $0x7] sm:$0x1] %v98_v7  ;;  %s541_s24 = smov (!%p253_p0, %s103_s24), 63  ;;  %p120_p3 = scmp.gt.s32.totalorder %s460_s13, 0 }
  0x3e   :  { %s543_s1 = smov (!%p111_p1, %s458_s1), 0  ;;  %s106_s26 = scalar_lea.vmem [#allocation4], %s541_s24 }
  0x3f   :  { %v107_v8 = vld [vmem:[%s106_s26] sm:$0x1]  ;;  %s545_s1 = smov (!%p259_p2, %s543_s1), 63  ;;  %p265_p4 = scmp.lt.s32.totalorder %s460_s13, 63 }
  0x40   :  { %108 = vst [vmem:[#allocation7 + $0x8] sm:$0x1] %v107_v8  ;;  %s121_s27 = scalar_select %p120_p3, %s460_s13, 0 }
  0x41   :  { %s115_s0 = scalar_lea.vmem [#allocation4], %s545_s1  ;;  %p129_p5 = scmp.gt.s32.totalorder %s462_s14, 0 }
  0x42   :  { %v116_v9 = vld [vmem:[%s115_s0] sm:$0x1]  ;;  %p271_p6 = scmp.lt.s32.totalorder %s462_s14, 63  ;;  %s547_s27 = smov (!%p265_p4, %s121_s27), 63 }
  0x43   :  { %117 = vst [vmem:[#allocation7 + $0x9] sm:$0x1] %v116_v9  ;;  %s549_s14 = smov (!%p129_p5, %s462_s14), 0  ;;  %s276_s30 = sld [smem:[#allocation3 + $0xc]] }
  0x44   :  { %s124_s3 = scalar_lea.vmem [#allocation4], %s547_s27  ;;  %s551_s14 = smov (!%p271_p6, %s549_s14), 63 }
  0x45   :  { %v125_v10 = vld [vmem:[%s124_s3] sm:$0x1]  ;;  %s282_s4 = sld [smem:[#allocation3 + $0xd]]  ;;  %s133_s5 = scalar_lea.vmem [#allocation4], %s551_s14 }
  0x46   :  { %126 = vst [vmem:[#allocation7 + $0xa] sm:$0x1] %v125_v10  ;;  %v134_v11 = vld [vmem:[%s133_s5] sm:$0x1]  ;;  %s288_s6 = sld [smem:[#allocation3 + $0xe]]  ;;  %s294_s7 = sld [smem:[#allocation3 + $0xf]] }
  0x47   :  { %135 = vst [vmem:[#allocation7 + $0xb] sm:$0x1] %v134_v11  ;;  %s401_s11 = smov [#allocation7]  }
  0x48   :  { %s177_s12 = sshll.u32 %s401_s11, 4  ;;  %s178_s12 = int_to_ptr.vmem [resolvable:$true] %s177_s12 }
  0x49   :  { %p138_p7 = scmp.gt.s32.totalorder %s276_s30, 0  ;;  %p277_p8 = scmp.lt.s32.totalorder %s276_s30, 63 }
  0x4a   :  { %s369_s14 = scalar_lea.vmem %s178_s12, 256  ;;  %p374_p2 = scmp.lt.s32.totalorder %s178_s12, %s178_s12 }
  0x4b   :  { %s553_s30 = smov (!%p138_p7, %s276_s30), 0  ;;  %p147_p9 = scmp.gt.s32.totalorder %s282_s4, 0 }
  0x4c   :  { %p283_p10 = scmp.lt.s32.totalorder %s282_s4, 63  ;;  %s555_s30 = smov (!%p277_p8, %s553_s30), 63 }
  0x4d   :  { %s557_s4 = smov (!%p147_p9, %s282_s4), 0  ;;  %p156_p11 = scmp.gt.s32.totalorder %s288_s6, 0 }
  0x4e   :  { %s142_s8 = scalar_lea.vmem [#allocation4], %s555_s30  ;;  %s559_s4 = smov (!%p283_p10, %s557_s4), 63 }
  0x4f   :  { %v143_v12 = vld [vmem:[%s142_s8] sm:$0x1]  ;;  %s157_s9 = scalar_select %p156_p11, %s288_s6, 0 }
  0x50   :  { %144 = vst [vmem:[#allocation7 + $0xc] sm:$0x1] %v143_v12  ;;  %p289_p12 = scmp.lt.s32.totalorder %s288_s6, 63  ;;  %s151_s10 = scalar_lea.vmem [#allocation4], %s559_s4 }
  0x51   :  { %v152_v13 = vld [vmem:[%s151_s10] sm:$0x1]  ;;  %p165_p13 = scmp.gt.s32.totalorder %s294_s7, 0  ;;  %p295_p0 = scmp.lt.s32.totalorder %s294_s7, 63 }
  0x52   :  { %153 = vst [vmem:[#allocation7 + $0xd] sm:$0x1] %v152_v13  ;;  %s561_s9 = smov (!%p289_p12, %s157_s9), 63  ;;  %p370_p1 = scmp.ne.s32.totalorder %s178_s12, %s369_s14 }
  0x53   :  { %s563_s7 = smov (!%p165_p13, %s294_s7), 0  ;;  %s160_s1 = scalar_lea.vmem [#allocation4], %s561_s9 }
  0x54   :  { %v161_v14 = vld [vmem:[%s160_s1] sm:$0x1]  ;;  %s565_s7 = smov (!%p295_p0, %s563_s7), 63  ;;  %p375_p3 = scmp.lt.s32.totalorder %s369_s14, %s369_s14 }
  0x55   :  { %162 = vst [vmem:[#allocation7 + $0xe] sm:$0x1] %v161_v14  ;;  %s169_s13 = scalar_lea.vmem [#allocation4], %s565_s7 }
  0x56   :  { %v170_v15 = vld [vmem:[%s169_s13] sm:$0x1]  ;;  %p376_p4 = por %p375_p3, %p374_p2 }
  0x57   :  { %171 = vst [vmem:[#allocation7 + $0xf] sm:$0x1] %v170_v15 }
  0x58   :  { %p377_p5 = pnand %p376_p4, %p370_p1 }
  0x5a   :  { %380 = shalt.err (!%p377_p5)
}
  0x5b   :  { %s381_s17 = scalar_lea.hbm %s511_s2, 256 }
  0x5c   :  { %p382_p6 = scmp.ne.s32.totalorder %s511_s2, %s381_s17  ;;  %p385_p7 = scmp.lt.u32.totalorder %s381_s17, %s511_s2 }
  0x5e   :  { %p387_p8 = pnand %p385_p7, %p382_p6 }
  0x60   :  { %390 = shalt.err (!%p387_p8)
}
  0x61   :  { %183 = dma.vmem_to_hbm [thread:$0]  %s178_s12, 256, %s511_s2, [#allocation6], %s399_s28, %s399_s28, %s400_s29  }
  0x62   :  { %395 = dma.done.wait [#allocation6], 256  }
  0x63   :  { %396 = vsyncadd [#allocation6], 4294967040 }
  0x64   :  { %187 = vsyncpa [#allocation5], 1 }
  0x65   :  { %188 = vsyncpa [#allocation6], 1 }

</bundles_post_ra>
